<compile_context>
chip_gen: v6e
topology: v6e:2x2x1
jax: 0.10.0
libtpu: 0.0.40
codegen_flags: <defaults>
</compile_context>

<pallas_src>
import functools

import jax
import jax.numpy as jnp
from jax.experimental import pallas as pl
from jax.experimental.pallas import tpu as pltpu

LANES = 128
SUBLANES = 8
MAX_TILE_R = 4096           # (4096, 128) f32 = 2 MiB per input block
_CHUNK = SUBLANES * LANES   # 1024 elements


def _fold_rows(x, tile_r):
    """Sum a (tile_r, 128) f32 tile into (8, 128) with pure VPU adds."""
    n = tile_r // SUBLANES
    if n % 4 == 0 and n >= 8:
        # 4 interleaved partial-accumulator chains (one per VALU slot), then a
        # 3-add collapse -- breaks the long dependent vadd chain.
        part = x.reshape(n // 4, 4, SUBLANES, LANES).sum(axis=0)
        return part.sum(axis=0)
    return x.reshape(n, SUBLANES, LANES).sum(axis=0)


def _masked_l1_kernel(p_ref, t_ref, o_ref, *, tile_r, blocks_per_shard, rows):
    # The (8, 256) output block is the resident accumulator for this shard:
    # lanes [0,128) hold per-lane partial |diff| sums, lanes [128,256) hold
    # per-lane partial valid counts.  Zero it on the first inner-grid step.
    @pl.when(pl.program_id(1) == 0)
    def _():
        o_ref[...] = jnp.zeros_like(o_ref)

    b = pl.program_id(0) * blocks_per_shard + pl.program_id(1)  # logical block
    row0 = b * tile_r

    p = p_ref[...].astype(jnp.float32)
    t = t_ref[...].astype(jnp.float32)

    def accumulate(valid):
        diff = jnp.where(valid, jnp.abs(t - p), 0.0)
        cnt = valid.astype(jnp.float32)
        o_ref[:, :LANES] += _fold_rows(diff, tile_r)
        o_ref[:, LANES:] += _fold_rows(cnt, tile_r)

    # Steady state: every row of this block is real data -> no iota, no bound
    # check, just `target > 0`.
    is_interior = row0 + tile_r <= rows

    @pl.when(is_interior)
    def _():
        accumulate(t > 0)

    # Ragged last block / the second shard's overrun block: mask rows past the
    # real array (their DMA'd contents are unspecified or duplicated).
    @pl.when(jnp.logical_not(is_interior))
    def _():
        rid = jax.lax.broadcasted_iota(jnp.int32, (tile_r, LANES), 0) + row0
        accumulate(jnp.logical_and(rid < rows, t > 0))


def masked_l1_loss(pred, target):
    assert pred.ndim == target.ndim, "inconsistent dimensions"
    assert pred.shape == target.shape, "inconsistent dimensions"
    n = pred.size
    pf = pred.reshape(-1)
    tf = target.reshape(-1)

    if n % _CHUNK == 0:
        n_pad = n            # common case: zero-copy
    elif n % LANES == 0 and n // LANES >= MAX_TILE_R:
        n_pad = n            # large lane-aligned input: skip the full-HBM pad
                             # copy; the ragged last block is masked in-kernel
    else:
        # Small or non-128-multiple inputs: pad with zeros (padded target == 0
        # is automatically invalid, so semantics are unchanged).
        # TODO(synk): a plain-JAX tail sum would avoid this copy for huge
        # inputs whose size is not a multiple of 128.
        n_pad = ((n + _CHUNK - 1) // _CHUNK) * _CHUNK
        pf = jnp.pad(pf, (0, n_pad - n))
        tf = jnp.pad(tf, (0, n_pad - n))

    rows = n_pad // LANES
    tile_r = MAX_TILE_R if rows >= MAX_TILE_R else rows  # always a mult. of 8
    total_blocks = pl.cdiv(rows, tile_r)

    # Always split across 2 shards when there is more than one block so both
    # v7x TensorCores stay busy (harmless 2-iteration loop on v5e/v6e).
    num_shards = 2 if total_blocks >= 2 else 1
    bps = pl.cdiv(total_blocks, num_shards)
    last_blk = total_blocks - 1

    p2 = pf.reshape(rows, LANES)        # contiguous reshape: free
    t2 = tf.reshape(rows, LANES)

    in_blk = pl.BlockSpec(
        (tile_r, LANES),
        lambda s, j: (jnp.minimum(s * bps + j, last_blk), 0))
    out_blk = pl.BlockSpec((SUBLANES, 2 * LANES), lambda s, j: (s, 0))

    kernel = functools.partial(
        _masked_l1_kernel, tile_r=tile_r, blocks_per_shard=bps, rows=rows)

    out = pl.pallas_call(
        kernel,
        out_shape=jax.ShapeDtypeStruct(
            (num_shards * SUBLANES, 2 * LANES), jnp.float32),
        grid=(num_shards, bps),
        in_specs=[in_blk, in_blk],
        out_specs=out_blk,
        compiler_params=pltpu.CompilerParams(
            dimension_semantics=("parallel", "arbitrary"),
            vmem_limit_bytes=48 * 1024 * 1024),
    )(p2, t2)

    s_abs = jnp.sum(out[:, :LANES])
    n_valid = jnp.sum(out[:, LANES:])
    # Counts accumulate in f32 (exact up to ~2^24 valid elements); an
    # all-invalid target gives 0/0 -> NaN, matching torch.mean over an empty
    # selection.
    return s_abs / n_valid


def masked_l1_loss_ref(pred, target):
    # Pure-JAX reference with identical semantics (for verification).
    pred = pred.astype(jnp.float32)
    target = target.astype(jnp.float32)
    valid = target > 0
    diff = jnp.where(valid, jnp.abs(target - pred), 0.0)
    return jnp.sum(diff) / jnp.sum(valid.astype(jnp.float32))


if __name__ == "__main__":
    key = jax.random.PRNGKey(0)
    k1, k2 = jax.random.split(key)
    # Inputs analogous to NCHW depth maps: batch=2, channels=4, spatial=16x16.
    pred = jax.random.normal(k1, (2, 4, 16, 16), dtype=jnp.float32)
    # target has a mix of positive (valid) and non-positive (invalid) entries.
    target = jax.random.normal(k2, (2, 4, 16, 16), dtype=jnp.float32)

    loss = masked_l1_loss(pred, target)
    jax.block_until_ready(loss)

    ref = masked_l1_loss_ref(pred, target)
    assert jnp.allclose(loss, ref, rtol=1e-5, atol=1e-5), (loss, ref)
    print("KERNEL_OK")
</pallas_src>

<mosaic_0001>
module attributes {stable_mosaic.version = 11 : i64} {
  func.func @_masked_l1_kernel(%arg0: i32, %arg1: i32, %arg2: memref<16x128xf32, #tpu.memory_space<vmem>>, %arg3: memref<16x128xf32, #tpu.memory_space<vmem>>, %arg4: memref<8x256xf32, #tpu.memory_space<vmem>>) attributes {dimension_semantics = [#tpu.dimension_semantics<parallel>, #tpu.dimension_semantics<arbitrary>], iteration_bounds = array<i64: 1, 1>, scalar_prefetch = 0 : i64, scratch_operands = 0 : i64, tpu.core_type = #tpu.core_type<tc>, window_params = [{transform_indices = @transform_0, window_bounds = array<i64: 16, 128>}, {transform_indices = @transform_1, window_bounds = array<i64: 16, 128>}, {transform_indices = @transform_2, window_bounds = array<i64: 8, 256>}]} {
    %c0_i32 = arith.constant 0 : i32
    %0 = arith.cmpi eq, %arg1, %c0_i32 : i32
    %1 = arith.extui %0 : i1 to i32
    %c0_i32_0 = arith.constant 0 : i32
    %2 = arith.cmpi ne, %1, %c0_i32_0 : i32
    scf.if %2 {
      %cst = arith.constant 0.000000e+00 : f32
      %15 = vector.broadcast %cst : f32 to vector<8x256xf32>
      %c0_8 = arith.constant 0 : index
      %c0_9 = arith.constant 0 : index
      %16 = vector.load %arg4[%c0_8, %c0_9] : memref<8x256xf32, #tpu.memory_space<vmem>>, vector<8x256xf32>
      tpu.vector_store %arg4[%c0_8, %c0_9], %15 {strides = array<i32>} : memref<8x256xf32, #tpu.memory_space<vmem>>, vector<8x256xf32>,
    } else {
    }
    %c1_i32 = arith.constant 1 : i32
    %3 = arith.muli %arg0, %c1_i32 : i32
    %4 = arith.addi %3, %arg1 : i32
    %c16_i32 = arith.constant 16 : i32
    %5 = arith.muli %4, %c16_i32 : i32
    %c0 = arith.constant 0 : index
    %c0_1 = arith.constant 0 : index
    %6 = vector.load %arg2[%c0, %c0_1] : memref<16x128xf32, #tpu.memory_space<vmem>>, vector<16x128xf32>
    %c0_2 = arith.constant 0 : index
    %c0_3 = arith.constant 0 : index
    %7 = vector.load %arg3[%c0_2, %c0_3] : memref<16x128xf32, #tpu.memory_space<vmem>>, vector<16x128xf32>
    %c16_i32_4 = arith.constant 16 : i32
    %8 = arith.addi %5, %c16_i32_4 : i32
    %c16_i32_5 = arith.constant 16 : i32
    %9 = arith.cmpi sle, %8, %c16_i32_5 : i32
    %10 = arith.extui %9 : i1 to i32
    %c0_i32_6 = arith.constant 0 : i32
    %11 = arith.cmpi ne, %10, %c0_i32_6 : i32
    scf.if %11 {
      %cst = arith.constant 0.000000e+00 : f32
      %15 = vector.broadcast %cst : f32 to vector<16x128xf32>
      %16 = arith.cmpf ogt, %7, %15 : vector<16x128xf32>
      %17 = arith.subf %7, %6 : vector<16x128xf32>
      %18 = math.absf %17 : vector<16x128xf32>
      %cst_8 = arith.constant 0.000000e+00 : f32
      %19 = vector.broadcast %cst_8 : f32 to vector<16x128xf32>
      %20 = arith.select %16, %18, %19 : vector<16x128xi1>, vector<16x128xf32>
      %21 = arith.extui %16 : vector<16x128xi1> to vector<16x128xi32>
      %22 = arith.sitofp %21 : vector<16x128xi32> to vector<16x128xf32>
      %c0_9 = arith.constant 0 : index
      %c0_10 = arith.constant 0 : index
      %23 = vector.load %arg4[%c0_9, %c0_10] : memref<8x256xf32, #tpu.memory_space<vmem>>, vector<8x128xf32>
      %24 = vector.shape_cast %20 : vector<16x128xf32> to vector<2x8x128xf32>
      %cst_11 = arith.constant dense<0.000000e+00> : vector<8x128xf32>
      %25 = vector.multi_reduction <add>, %24, %cst_11 [0] : vector<2x8x128xf32> to vector<8x128xf32>
      %26 = arith.addf %23, %25 : vector<8x128xf32>
      %c0_12 = arith.constant 0 : index
      %c0_13 = arith.constant 0 : index
      %27 = vector.load %arg4[%c0_12, %c0_13] : memref<8x256xf32, #tpu.memory_space<vmem>>, vector<8x128xf32>
      tpu.vector_store %arg4[%c0_12, %c0_13], %26 {strides = array<i32>} : memref<8x256xf32, #tpu.memory_space<vmem>>, vector<8x128xf32>,
      %c0_14 = arith.constant 0 : index
      %c128 = arith.constant 128 : index
      %28 = vector.load %arg4[%c0_14, %c128] : memref<8x256xf32, #tpu.memory_space<vmem>>, vector<8x128xf32>
      %29 = vector.shape_cast %22 : vector<16x128xf32> to vector<2x8x128xf32>
      %cst_15 = arith.constant dense<0.000000e+00> : vector<8x128xf32>
      %30 = vector.multi_reduction <add>, %29, %cst_15 [0] : vector<2x8x128xf32> to vector<8x128xf32>
      %31 = arith.addf %28, %30 : vector<8x128xf32>
      %c0_16 = arith.constant 0 : index
      %c128_17 = arith.constant 128 : index
      %32 = vector.load %arg4[%c0_16, %c128_17] : memref<8x256xf32, #tpu.memory_space<vmem>>, vector<8x128xf32>
      tpu.vector_store %arg4[%c0_16, %c128_17], %31 {strides = array<i32>} : memref<8x256xf32, #tpu.memory_space<vmem>>, vector<8x128xf32>,
    } else {
    }
    %true = arith.constant true
    %12 = arith.xori %9, %true : i1
    %13 = arith.extui %12 : i1 to i32
    %c0_i32_7 = arith.constant 0 : i32
    %14 = arith.cmpi ne, %13, %c0_i32_7 : i32
    scf.if %14 {
      %15 = tpu.iota {dimensions = array<i32: 0>} : vector<16x128xi32>
      %16 = vector.broadcast %5 : i32 to vector<16x128xi32>
      %17 = arith.addi %15, %16 : vector<16x128xi32>
      %c16_i32_8 = arith.constant 16 : i32
      %18 = vector.broadcast %c16_i32_8 : i32 to vector<16x128xi32>
      %19 = arith.cmpi slt, %17, %18 : vector<16x128xi32>
      %cst = arith.constant 0.000000e+00 : f32
      %20 = vector.broadcast %cst : f32 to vector<16x128xf32>
      %21 = arith.cmpf ogt, %7, %20 : vector<16x128xf32>
      %22 = arith.andi %19, %21 : vector<16x128xi1>
      %23 = arith.subf %7, %6 : vector<16x128xf32>
      %24 = math.absf %23 : vector<16x128xf32>
      %cst_9 = arith.constant 0.000000e+00 : f32
      %25 = vector.broadcast %cst_9 : f32 to vector<16x128xf32>
      %26 = arith.select %22, %24, %25 : vector<16x128xi1>, vector<16x128xf32>
      %27 = arith.extui %22 : vector<16x128xi1> to vector<16x128xi32>
      %28 = arith.sitofp %27 : vector<16x128xi32> to vector<16x128xf32>
      %c0_10 = arith.constant 0 : index
      %c0_11 = arith.constant 0 : index
      %29 = vector.load %arg4[%c0_10, %c0_11] : memref<8x256xf32, #tpu.memory_space<vmem>>, vector<8x128xf32>
      %30 = vector.shape_cast %26 : vector<16x128xf32> to vector<2x8x128xf32>
      %cst_12 = arith.constant dense<0.000000e+00> : vector<8x128xf32>
      %31 = vector.multi_reduction <add>, %30, %cst_12 [0] : vector<2x8x128xf32> to vector<8x128xf32>
      %32 = arith.addf %29, %31 : vector<8x128xf32>
      %c0_13 = arith.constant 0 : index
      %c0_14 = arith.constant 0 : index
      %33 = vector.load %arg4[%c0_13, %c0_14] : memref<8x256xf32, #tpu.memory_space<vmem>>, vector<8x128xf32>
      tpu.vector_store %arg4[%c0_13, %c0_14], %32 {strides = array<i32>} : memref<8x256xf32, #tpu.memory_space<vmem>>, vector<8x128xf32>,
      %c0_15 = arith.constant 0 : index
      %c128 = arith.constant 128 : index
      %34 = vector.load %arg4[%c0_15, %c128] : memref<8x256xf32, #tpu.memory_space<vmem>>, vector<8x128xf32>
      %35 = vector.shape_cast %28 : vector<16x128xf32> to vector<2x8x128xf32>
      %cst_16 = arith.constant dense<0.000000e+00> : vector<8x128xf32>
      %36 = vector.multi_reduction <add>, %35, %cst_16 [0] : vector<2x8x128xf32> to vector<8x128xf32>
      %37 = arith.addf %34, %36 : vector<8x128xf32>
      %c0_17 = arith.constant 0 : index
      %c128_18 = arith.constant 128 : index
      %38 = vector.load %arg4[%c0_17, %c128_18] : memref<8x256xf32, #tpu.memory_space<vmem>>, vector<8x128xf32>
      tpu.vector_store %arg4[%c0_17, %c128_18], %37 {strides = array<i32>} : memref<8x256xf32, #tpu.memory_space<vmem>>, vector<8x128xf32>,
    } else {
    }
    return
  }
  func.func @transform_0(%arg0: i32, %arg1: i32) -> (i32, i32) {
    %c1_i32 = arith.constant 1 : i32
    %0 = arith.muli %arg0, %c1_i32 : i32
    %1 = arith.addi %0, %arg1 : i32
    %c0_i32 = arith.constant 0 : i32
    %2 = arith.minsi %1, %c0_i32 : i32
    %c0_i32_0 = arith.constant 0 : i32
    %c0_i32_1 = arith.constant 0 : i32
    return %2, %c0_i32_0 : i32, i32
  }
  func.func @transform_1(%arg0: i32, %arg1: i32) -> (i32, i32) {
    %c1_i32 = arith.constant 1 : i32
    %0 = arith.muli %arg0, %c1_i32 : i32
    %1 = arith.addi %0, %arg1 : i32
    %c0_i32 = arith.constant 0 : i32
    %2 = arith.minsi %1, %c0_i32 : i32
    %c0_i32_0 = arith.constant 0 : i32
    %c0_i32_1 = arith.constant 0 : i32
    return %2, %c0_i32_0 : i32, i32
  }
  func.func @transform_2(%arg0: i32, %arg1: i32) -> (i32, i32) {
    %c0_i32 = arith.constant 0 : i32
    %c0_i32_0 = arith.constant 0 : i32
    return %arg0, %c0_i32 : i32, i32
  }
}

</mosaic_0001>

<bundles_post_ra>
// kernel: tpu_custom_call.1
= control target key start
LH: loop header
LB: loop body
LE: loop exit
PB: predicated region body
PF: predicated region fallthrough
CT: control target
= control target key end

     0   :  { %7 = vsyncpa [#allocation3], 0  ;;  %s257_s0 = inlined_call_operand.hbm [shape: f32[16,128], index: 0, kind: input, shape index: {}]   ;;  %s258_s1 = inlined_call_operand.hbm [shape: f32[16,128], index: 1, kind: input, shape index: {}]   ;;  %s259_s2 = inlined_call_operand.hbm [shape: f32[8,256], index: 2, kind: output, shape index: {}]  }
   0x1   :  { %8 = vsyncpa [#allocation6], 0 }
   0x2   :  { %9 = vsyncpa [#allocation4], 0  ;;  %s227_s9 = smov [#allocation2]  }
   0x3   :  { %s21_s10 = sshll.u32 %s227_s9, 4  ;;  %s22_s10 = int_to_ptr.vmem [resolvable:$true] %s21_s10 }
   0x4   :  { %s169_s11 = scalar_lea.vmem %s22_s10, 256  ;;  %p174_p1 = scmp.lt.s32.totalorder %s22_s10, %s22_s10 }
   0x5   :  { %p170_p0 = scmp.ne.s32.totalorder %s22_s10, %s169_s11  ;;  %p175_p2 = scmp.lt.s32.totalorder %s169_s11, %s169_s11 }
   0x7   :  { %p176_p3 = por %p175_p2, %p174_p1 }
   0x9   :  { %p177_p4 = pnand %p176_p3, %p170_p0 }
   0xb   :  { %180 = shalt.err (!%p177_p4)
}
   0xc   :  { %s228_s12 = smov 128   ;;  %s229_s13 = smov 8  }
   0xd   :  { %27 = dma.hbm_to_vmem [thread:$0]  %s257_s0, 256, %s22_s10, [#allocation3], %s228_s12, %s228_s12, %s229_s13  }
   0xe   :  { %s230_s16 = smov [#allocation5]  }
   0xf   :  { %s39_s17 = sshll.u32 %s230_s16, 4  ;;  %s40_s17 = int_to_ptr.vmem [resolvable:$true] %s39_s17 }
  0x10   :  { %s189_s18 = scalar_lea.vmem %s40_s17, 256  ;;  %p194_p6 = scmp.lt.s32.totalorder %s40_s17, %s40_s17 }
  0x11   :  { %p190_p5 = scmp.ne.s32.totalorder %s40_s17, %s189_s18  ;;  %p195_p7 = scmp.lt.s32.totalorder %s189_s18, %s189_s18 }
  0x13   :  { %p196_p8 = por %p195_p7, %p194_p6 }
  0x15   :  { %p197_p9 = pnand %p196_p8, %p190_p5 }
  0x17   :  { %200 = shalt.err (!%p197_p9)
}
  0x18   :  { %45 = dma.hbm_to_vmem [thread:$0]  %s258_s1, 256, %s40_s17, [#allocation6], %s228_s12, %s228_s12, %s229_s13  }
  0x19   :  { %221 = dma.done.wait [#allocation3], 256  }
  0x1a   :  { %222 = vsyncadd [#allocation3], 4294967040 }
  0x1b   :  { %223 = dma.done.wait [#allocation6], 256  }
  0x1c   :  { %224 = vsyncadd [#allocation6], 4294967040  ;;  %v68_v0 = vld [vmem:[#allocation2] sm:$0xff]  ;;  %v69_v1 = vld [vmem:[#allocation2 + $0x8] sm:$0xff]  ;;  %v231_v6 = vmov 0.0   ;;  %s232_s0 = smov [#allocation7]  }
  0x1d   :  { %v70_v2 = vld [vmem:[#allocation5] sm:$0xff]  ;;  %v71_v3 = vld [vmem:[#allocation5 + $0x8] sm:$0xff]  ;;  %s137_s1 = sshll.u32 %s232_s0, 4  ;;  %s138_s1 = int_to_ptr.vmem [resolvable:$true] %s137_s1 }
  0x1e   :  { %vm77_vm0 = vcmp.gt.f32.partialorder %v70_v2, 0.0  ;;  %v79_v4 = vsub.f32 %v70_v2, %v68_v0  ;;  %vm78_vm1 = vcmp.gt.f32.partialorder %v71_v3, 0.0  ;;  %v80_v5 = vsub.f32 %v71_v3, %v69_v1  ;;  %s201_s21 = scalar_lea.vmem %s138_s1, 256  ;;  %p206_p11 = scmp.lt.s32.totalorder %s138_s1, %s138_s1 }
  0x1f   :  { %v151_v7 = vsel %vm77_vm0, 1.0, %v231_v6  ;;  %v152_v9 = vsel %vm78_vm1, 1.0, %v231_v6  ;;  %p202_p10 = scmp.ne.s32.totalorder %s138_s1, %s201_s21  ;;  %p207_p12 = scmp.lt.s32.totalorder %s201_s21, %s201_s21 }
  0x20   :  { %v81_v8 = vand.u32 2147483647, %v79_v4  ;;  %v82_v10 = vand.u32 2147483647, %v80_v5  ;;  %v94_v11 = vadd.f32 %v152_v9, %v151_v7 }
  0x21   :  { %p208_p13 = por %p207_p12, %p206_p11 }
  0x22   :  { %v83_v12 = vsel %vm77_vm0, %v81_v8, 0.0  ;;  %v84_v13 = vsel %vm78_vm1, %v82_v10, 0.0  ;;  %96 = vst [vmem:[#allocation7 + $0x8] sm:$0xff] %v94_v11 }
  0x23   :  { %v90_v14 = vadd.f32 %v84_v13, %v83_v12  ;;  %p209_p0 = pnand %p208_p13, %p202_p10 }
  0x25   :  { %92 = vst [vmem:[#allocation7] sm:$0xff] %v90_v14 }
  0x26   :  { %212 = shalt.err (!%p209_p0)
}
  0x27   :  { %140 = dma.vmem_to_hbm [thread:$0]  %s138_s1, 256, %s259_s2, [#allocation4]  }
  0x28   :  { %225 = dma.done.wait [#allocation4], 256  }
  0x29   :  { %226 = vsyncadd [#allocation4], 4294967040 }
  0x2a   :  { %144 = vsyncpa [#allocation3], 1 }
  0x2b   :  { %145 = vsyncpa [#allocation6], 1 }
  0x2c   :  { %146 = vsyncpa [#allocation4], 1 }

</bundles_post_ra>
